<compile_context>
chip_gen: v7x
topology: tpu7x:2x2x1
jax: 0.10.0
libtpu: 0.0.40
codegen_flags: <defaults>
</compile_context>

<pallas_src>
import functools

import jax
import jax.numpy as jnp
from jax.experimental import pallas as pl
from jax.experimental.pallas import tpu as pltpu


_TB_CAP = 16  # max batches per grid step (fully-unrolled in-kernel loop)
_MXU_NATIVE_DTYPES = (jnp.dtype(jnp.float32), jnp.dtype(jnp.bfloat16))


def _vmem_capacity_bytes():
    try:
        info = pltpu.get_tpu_info()
        cap = getattr(info, "vmem_capacity_bytes", None)
        if cap:
            return int(cap)
    except Exception:
        pass
    return 64 * 1024 * 1024  # conservative fallback: v7x per-TC VMEM


def _as_mxu_operand(v):
    # bf16 / f32 go to the MXU natively (accumulation is forced to f32 at the
    # dot); only int / other dtypes are up-cast, matching torch .float().
    if jnp.dtype(v.dtype) in _MXU_NATIVE_DTYPES:
        return v
    return v.astype(jnp.float32)


def _pool_kernel(pm_ref, x_ref, o_ref, *, tb, num_pool, M, D, concat_in_kernel):
    # pm_ref block: (tb, num_pool*M, N)   packed P^T for tb batches, native dtype
    # x_ref  block: (tb, N, D)            x for the same tb batches
    # o_ref  block: (tb, M, num_pool*D)   if concat_in_kernel
    #               (tb, num_pool*M, D)   otherwise (wrapper reshapes)
    for t in range(tb):  # tb <= _TB_CAP: short fixed loop, fully unrolled
        pm_t = _as_mxu_operand(pm_ref[t])   # (num_pool*M, N)
        xb_t = _as_mxu_operand(x_ref[t])    # (N, D)
        if pm_t.dtype != xb_t.dtype:
            # Mixed dtypes: promote both (keeps lax.dot_general happy; the fast
            # native-bf16 path only applies when BOTH operands are bf16).
            common = jnp.promote_types(pm_t.dtype, xb_t.dtype)
            pm_t = pm_t.astype(common)
            xb_t = xb_t.astype(common)

        res = jax.lax.dot_general(
            pm_t, xb_t,
            dimension_numbers=(((1,), (0,)), ((), ())),
            preferred_element_type=jnp.float32,
        )  # (num_pool*M, D), f32

        if concat_in_kernel:
            # torch.cat(..., dim=2): lane-aligned (D % 128 == 0) and
            # sublane-aligned (M % 8 == 0) static slab stores.
            for p in range(num_pool):
                o_ref[t, :, p * D:(p + 1) * D] = res[p * M:(p + 1) * M, :]
        else:
            o_ref[t] = res


def pack_pool_matrices(pool_matrices):
    """One-time packing of the (static) pool matrices for the kernel.

    [num_pool, B, N, M] -> [B, num_pool*M, N] (native dtype, NOT up-cast).
    Do this once at model-build time and reuse across forward calls; doing it
    per call costs an extra HBM relayout pass over the largest tensor.
    """
    num_pool, B, N, M = pool_matrices.shape
    return jnp.transpose(pool_matrices, (1, 0, 3, 2)).reshape(B, num_pool * M, N)


def _choose_tb(B, per_batch_bytes, vmem_cap):
    budget = int(0.375 * vmem_cap)  # double-buffered tiles, ~25% headroom
    tb_vmem = max(1, budget // max(1, 2 * per_batch_bytes))
    tb = min(_TB_CAP, tb_vmem, B)
    if B >= 2:
        tb = min(tb, max(1, B // 2))  # keep >= 2 grid steps for v7x megacore
    return max(1, tb)


def pool_forward_packed(pm_packed, x, num_pool):
    """Hot-path entry point.

    pm_packed: [B, num_pool*M, N] from pack_pool_matrices (any dtype)
    x:         [B, N, D]
    returns:   [B, M, num_pool*D] float32
    """
    B, PM, N = pm_packed.shape
    Bx, Nx, D = x.shape
    assert Bx == B and Nx == N, (pm_packed.shape, x.shape)
    assert PM % num_pool == 0, (PM, num_pool)
    M = PM // num_pool

    # Lane/sublane alignment decides whether the concat happens in-kernel
    # (unmasked, lane-dense stores) or via a fallback reshape in the wrapper.
    concat_in_kernel = (num_pool == 1) or (D % 128 == 0 and M % 8 == 0)

    per_batch_bytes = (
        PM * N * pm_packed.dtype.itemsize
        + N * D * x.dtype.itemsize
        + M * num_pool * D * 4  # f32 output
    )
    vmem_cap = _vmem_capacity_bytes()
    tb = _choose_tb(B, per_batch_bytes, vmem_cap)
    grid = (pl.cdiv(B, tb),)

    needed = 2 * tb * per_batch_bytes  # double-buffered tile footprint
    vmem_limit = int(min(0.75 * vmem_cap, max(2 * needed, 32 * 1024 * 1024)))

    if concat_in_kernel:
        out_shape = jax.ShapeDtypeStruct((B, M, num_pool * D), jnp.float32)
        out_spec = pl.BlockSpec((tb, M, num_pool * D), lambda b: (b, 0, 0))
    else:
        out_shape = jax.ShapeDtypeStruct((B, PM, D), jnp.float32)
        out_spec = pl.BlockSpec((tb, PM, D), lambda b: (b, 0, 0))

    cost = pl.CostEstimate(
        flops=2 * B * PM * N * D,
        transcendentals=0,
        bytes_accessed=(
            pm_packed.size * pm_packed.dtype.itemsize
            + x.size * x.dtype.itemsize
            + B * M * num_pool * D * 4
        ),
    )

    kernel = functools.partial(
        _pool_kernel,
        tb=tb,
        num_pool=num_pool,
        M=M,
        D=D,
        concat_in_kernel=concat_in_kernel,
    )

    grid_spec = pltpu.PrefetchScalarGridSpec(
        num_scalar_prefetch=0,
        grid=grid,  # batch-blocked; pools fused inside each per-batch matmul
        in_specs=[
            pl.BlockSpec((tb, PM, N), lambda b: (b, 0, 0)),
            pl.BlockSpec((tb, N, D), lambda b: (b, 0, 0)),
        ],
        out_specs=out_spec,
    )

    out = pl.pallas_call(
        kernel,
        out_shape=out_shape,
        grid_spec=grid_spec,
        compiler_params=pltpu.CompilerParams(
            dimension_semantics=("parallel",),  # megacore: shard batch blocks
            vmem_limit_bytes=vmem_limit,
        ),
        cost_estimate=cost,
    )(pm_packed, x)

    if concat_in_kernel:
        return out
    # Fallback (unaligned M/D only): realize torch.cat(..., dim=2) in the wrapper.
    return (
        out.reshape(B, num_pool, M, D)
        .transpose(0, 2, 1, 3)
        .reshape(B, M, num_pool * D)
    )


def pool_forward(pool_matrices, x):
    """Convenience wrapper: packs per call. Prefer pack_pool_matrices() once +
    pool_forward_packed() in a real model (pool matrices are static params)."""
    num_pool = pool_matrices.shape[0]
    return pool_forward_packed(pack_pool_matrices(pool_matrices), x, num_pool)


def pool_forward_ref(pool_matrices, x):
    """Pure-JAX reference (same semantics as the torch module)."""
    pm = pool_matrices.astype(jnp.float32)
    xf = x.astype(jnp.float32)
    results = [
        jnp.einsum("bnm,bnd->bmd", pm[i], xf, precision="highest")
        for i in range(pm.shape[0])
    ]
    return jnp.concatenate(results, axis=2) if len(results) > 1 else results[0]


if __name__ == "__main__":
    key = jax.random.PRNGKey(0)
    k1, k2 = jax.random.split(key)

    # Small shapes consistent with the module's forward.
    num_pool, B, N, M, D = 2, 2, 16, 8, 128
    pool_matrices = jax.random.normal(k1, (num_pool, B, N, M), dtype=jnp.float32)
    x = jax.random.normal(k2, (B, N, D), dtype=jnp.float32)

    # Hot-path usage: pack the static pool matrices ONCE, reuse across calls.
    pm_packed = pack_pool_matrices(pool_matrices)
    out = jax.block_until_ready(pool_forward_packed(pm_packed, x, num_pool))
    ref = pool_forward_ref(pool_matrices, x)
    assert out.shape == (B, M, num_pool * D), out.shape
    assert jnp.allclose(out, ref, atol=1e-3, rtol=1e-3), "mismatch vs reference (f32)"

    # Native bf16 path: both operands bf16 -> fed to the MXU without f32 pre-cast.
    pm_bf16 = pool_matrices.astype(jnp.bfloat16)
    x_bf16 = x.astype(jnp.bfloat16)
    out_bf = jax.block_until_ready(pool_forward(pm_bf16, x_bf16))
    ref_bf = pool_forward_ref(pm_bf16, x_bf16)
    assert jnp.allclose(out_bf, ref_bf, atol=1e-2, rtol=1e-2), "mismatch (bf16)"

    # Integer (assignment-style) pool matrices: exercise the in-kernel f32 up-cast,
    # mirroring torch .type(torch.FloatTensor).
    pm_int = (jax.random.uniform(k1, (num_pool, B, N, M)) > 0.5).astype(jnp.int32)
    out_int = jax.block_until_ready(pool_forward(pm_int, x))
    ref_int = pool_forward_ref(pm_int, x)
    assert jnp.allclose(out_int, ref_int, atol=1e-3, rtol=1e-3), "mismatch (int32)"

    print("KERNEL_OK")
</pallas_src>

<mosaic_0001>
module attributes {stable_mosaic.version = 11 : i64} {
  func.func @_pool_kernel(%arg0: i32, %arg1: memref<1x16x16xf32, #tpu.memory_space<vmem>>, %arg2: memref<1x16x128xf32, #tpu.memory_space<vmem>>, %arg3: memref<1x8x256xf32, #tpu.memory_space<vmem>>) attributes {dimension_semantics = [#tpu.dimension_semantics<parallel>], iteration_bounds = array<i64: 2>, scalar_prefetch = 0 : i64, scratch_operands = 0 : i64, tpu.core_type = #tpu.core_type<tc>, window_params = [{transform_indices = @transform_0, window_bounds = array<i64: 1, 16, 16>}, {transform_indices = @transform_1, window_bounds = array<i64: 1, 16, 128>}, {transform_indices = @transform_2, window_bounds = array<i64: 1, 8, 256>}]} {
    %c0 = arith.constant 0 : index
    %c0_0 = arith.constant 0 : index
    %c0_1 = arith.constant 0 : index
    %0 = vector.load %arg1[%c0, %c0_0, %c0_1] : memref<1x16x16xf32, #tpu.memory_space<vmem>>, vector<1x16x16xf32>
    %1 = vector.shape_cast %0 : vector<1x16x16xf32> to vector<16x16xf32>
    %c0_2 = arith.constant 0 : index
    %c0_3 = arith.constant 0 : index
    %c0_4 = arith.constant 0 : index
    %2 = vector.load %arg2[%c0_2, %c0_3, %c0_4] : memref<1x16x128xf32, #tpu.memory_space<vmem>>, vector<1x16x128xf32>
    %3 = vector.shape_cast %2 : vector<1x16x128xf32> to vector<16x128xf32>
    %cst = arith.constant dense<0.000000e+00> : vector<16x128xf32>
    %4 = tpu.matmul %1, %3, %cst {dimension_numbers = #tpu.dot_dimension_numbers<[1], [0], [0], [1], [0, 0, 1, 1], [], []>} : vector<16x16xf32>, vector<16x128xf32>, vector<16x128xf32> -> vector<16x128xf32>
    %5 = vector.extract_strided_slice %4 {offsets = [0, 0], sizes = [8, 128], strides = [1, 1]} : vector<16x128xf32> to vector<8x128xf32>
    %c0_5 = arith.constant 0 : index
    %c0_6 = arith.constant 0 : index
    %c0_7 = arith.constant 0 : index
    %6 = vector.load %arg3[%c0_5, %c0_6, %c0_7] : memref<1x8x256xf32, #tpu.memory_space<vmem>>, vector<1x8x128xf32>
    %7 = vector.shape_cast %6 : vector<1x8x128xf32> to vector<8x128xf32>
    %8 = vector.shape_cast %5 : vector<8x128xf32> to vector<1x8x128xf32>
    tpu.vector_store %arg3[%c0_5, %c0_6, %c0_7], %8 {strides = array<i32>} : memref<1x8x256xf32, #tpu.memory_space<vmem>>, vector<1x8x128xf32>,
    %9 = vector.extract_strided_slice %4 {offsets = [8, 0], sizes = [8, 128], strides = [1, 1]} : vector<16x128xf32> to vector<8x128xf32>
    %c0_8 = arith.constant 0 : index
    %c0_9 = arith.constant 0 : index
    %c128 = arith.constant 128 : index
    %10 = vector.load %arg3[%c0_8, %c0_9, %c128] : memref<1x8x256xf32, #tpu.memory_space<vmem>>, vector<1x8x128xf32>
    %11 = vector.shape_cast %10 : vector<1x8x128xf32> to vector<8x128xf32>
    %12 = vector.shape_cast %9 : vector<8x128xf32> to vector<1x8x128xf32>
    tpu.vector_store %arg3[%c0_8, %c0_9, %c128], %12 {strides = array<i32>} : memref<1x8x256xf32, #tpu.memory_space<vmem>>, vector<1x8x128xf32>,
    return
  }
  func.func @transform_0(%arg0: i32) -> (i32, i32, i32) {
    %c0_i32 = arith.constant 0 : i32
    %c0_i32_0 = arith.constant 0 : i32
    %c0_i32_1 = arith.constant 0 : i32
    return %arg0, %c0_i32, %c0_i32_0 : i32, i32, i32
  }
  func.func @transform_1(%arg0: i32) -> (i32, i32, i32) {
    %c0_i32 = arith.constant 0 : i32
    %c0_i32_0 = arith.constant 0 : i32
    %c0_i32_1 = arith.constant 0 : i32
    return %arg0, %c0_i32, %c0_i32_0 : i32, i32, i32
  }
  func.func @transform_2(%arg0: i32) -> (i32, i32, i32) {
    %c0_i32 = arith.constant 0 : i32
    %c0_i32_0 = arith.constant 0 : i32
    %c0_i32_1 = arith.constant 0 : i32
    return %arg0, %c0_i32, %c0_i32_0 : i32, i32, i32
  }
}

</mosaic_0001>

<bundles_post_ra>
// kernel: tpu_custom_call.1
= control target key start
LH: loop header
LB: loop body
LE: loop exit
PB: predicated region body
PF: predicated region fallthrough
CT: control target
= control target key end

     0   :  { %7 = vsyncpa [#allocation3], 0  ;;  %s862_s0 = inlined_call_operand.hbm [shape: f32[2,16,16], index: 0, kind: input, shape index: {}]   ;;  %s863_s1 = inlined_call_operand.hbm [shape: f32[2,16,128], index: 1, kind: input, shape index: {}]   ;;  %s864_s2 = inlined_call_operand.hbm [shape: f32[2,8,256], index: 2, kind: output, shape index: {}]  }
   0x1   :  { %9 = vsyncpa [#allocation3 + $0x1], 0 }
   0x2   :  { %10 = vsyncpa [#allocation6], 0 }
   0x3   :  { %12 = vsyncpa [#allocation6 + $0x1], 0 }
   0x4   :  { %13 = vsyncpa [#allocation4], 0 }
   0x5   :  { %15 = vsyncpa [#allocation4 + $0x1], 0  ;;  %s641_s9 = smov 0   ;;  %s643_s10 = smov 0  }
   0x6   :  { %s645_s11 = smov 0   ;;  %s647_s12 = smov 0  }
   0x7 LB: > { %s662_s13 = sadd.s32 4294967295, %s619_s12   ;;  %s398_s14 = sadd.s32 4294967294, %s619_s12   ;;  %s619_s12 = sphi %s647_s12, %s880_s12   ;;  %s615_s11 = sphi %s645_s11, %s879_s11   ;;  %s611_s10 = sphi %s643_s10, %s878_s10   ;;  %s607_s9 = sphi %s641_s9, %s877_s9  }
   0x8   : > { %s666_s15 = sadd.s32 1, %s619_s12   ;;  %s28_s16 = sadd.s32 1, %s615_s11 }
   0x9   : > { %s25_s17 = ssub.s32 %s619_s12, %s666_s15  ;;  %p35_p0 = scmp.ne.s32.totalorder %s615_s11, %s611_s10 }
   0xa   : > { %p26_p1 = scmp.eq.s32.totalorder %s25_s17, 0  ;;  %p36_p2 = scmp.eq.s32.totalorder %s619_s12, 0 }
   0xb   : > { %p41_p3 = scmp.ne.s32.totalorder %s611_s10, %s607_s9  ;;  %p42_p4 = scmp.eq.s32.totalorder %s662_s13, 0 }
   0xc   : > { %s678_s18 = scalar_select %p26_p1, %s615_s11, %s28_s16  }
   0xd   : > { %p680_p5 = por %p36_p2, %p35_p0  ;;  %p684_p6 = por %p42_p4, %p41_p3 }
   0xe   : > { %p91_p7 = scmp.eq.s32.totalorder %s662_s13, 1  ;;  %p97_p8 = scmp.eq.s32.totalorder %s398_s14, 1 }
   0xf   : > { %s868_s20 = scalar_select %p684_p6, 1, 0 }
  0x10   : > { %p453_p10 = scmp.lt.s32.totalorder %s619_s12, 2  ;;  %p691_p11 = por %p91_p7, %p35_p0 }
  0x11   : > { %p695_p12 = por %p97_p8, %p41_p3  ;;  %s700_s23 = sand.u32 1, %s615_s11  }
  0x12   : > { %s869_s21 = scalar_select %p691_p11, 1, 0 }
  0x13   : > { %s870_s22 = scalar_select %p695_p12, 1, 0 }
  0x14   : > { %s418_s24 = sshll.u32 %s619_s12, 8  ;;  %s401_s25 = sshll.u32 %s700_s23, 4 }
  0x15   : > { %s709_s28 = scalar_lea.hbm %s862_s0, %s418_s24  ;;  %s121_s29 = scalar_lea.vmem [#allocation2], %s401_s25 }
  0x16   : > { %s128_s30 = sshll.u32 %s121_s29, 4  ;;  %p715_p13 = pnand %p453_p10, %p680_p5  ;;  %s719_s30 = int_to_ptr.vmem [resolvable:$true] %s128_s30 }
  0x17   : > { %s118_s4 = scalar_lea.sflag [#allocation3], %s700_s23  ;;  %s489_s5 = scalar_lea.hbm %s709_s28, 256 }
  0x18   : > { %p490_p0 = scmp.ne.s32.totalorder %s709_s28, %s489_s5  ;;  %p491_p1 = pneg %p715_p13 }
  0x19   : > { %s494_s8 = scalar_lea.hbm %s862_s0, 512  ;;  %p495_p4 = scmp.lt.u32.totalorder %s709_s28, %s862_s0 }
  0x1a   : > { %p492_p2 = pnand %p491_p1, %p490_p0  ;;  %p496_p5 = scmp.lt.u32.totalorder %s494_s8, %s489_s5 }
  0x1b   : > { %p498_p8 = scmp.lt.u32.totalorder %s489_s5, %s709_s28 }
  0x1c   : > { %p493_p3 = pneg %p492_p2  ;;  %p497_p7 = por %p496_p5, %p495_p4 }
  0x1e   : > { %p499_p10 = por %p498_p8, %p497_p7 }
  0x20   : > { %p500_p9 = pnand %p499_p10, %p493_p3 }
  0x22   : > { %503 = shalt.err (!%p500_p9)
}
  0x23   : > { %s504_s17 = scalar_lea.vmem %s719_s30, 256  ;;  %s621_s19 = smov [#allocation2]  }
  0x24   : > { %p505_p0 = scmp.ne.s32.totalorder %s719_s30, %s504_s17  ;;  %s509_s26 = sshll.u32 %s621_s19, 4  ;;  %s510_s26 = int_to_ptr.vmem [resolvable:$false] %s509_s26 }
  0x25   : > { %s511_s27 = scalar_lea.vmem %s510_s26, 512  ;;  %p512_p11 = scmp.lt.s32.totalorder %s719_s30, %s510_s26 }
  0x26   : > { %p507_p2 = pnand %p505_p0, %p491_p1  ;;  %p513_p4 = scmp.lt.s32.totalorder %s511_s27, %s504_s17 }
  0x28   : > { %p508_p12 = pneg %p507_p2  ;;  %p514_p5 = por %p513_p4, %p512_p11 }
  0x2a   : > { %p515_p7 = pnand %p514_p5, %p508_p12 }
  0x2c   : > { %518 = shalt.err (!%p515_p7)
}
  0x2d   : > { %s622_s29 = smov 128   ;;  %s623_s5 = smov 8  }
  0x2e   : > { %445 = dma.hbm_to_vmem [thread:$0]  (!%p715_p13), %s709_s28, 256, %s719_s30, %s118_s4, %s622_s29, %s622_s29, %s623_s5  }
  0x2f   : > { %p407_p9 = scmp.ge.s32.totalorder %s619_s12, 1  ;;  %p157_p11 = scmp.lt.s32.totalorder %s619_s12, 3 }
  0x30   : > { %s763_s14 = scalar_lea.hbm %s863_s1, %s418_s24  ;;  %s142_s16 = scalar_lea.vmem [#allocation5], %s401_s25 }
  0x31   : > { %p754_p12 = pnand %p407_p9, %p157_p11  ;;  %s149_s17 = sshll.u32 %s142_s16, 4  ;;  %s767_s17 = int_to_ptr.vmem [resolvable:$true] %s149_s17 }
  0x32   : > { %s139_s28 = scalar_lea.sflag [#allocation6], %s700_s23  ;;  %s519_s30 = scalar_lea.hbm %s763_s14, 256 }
  0x33   : > { %p520_p3 = scmp.ne.s32.totalorder %s763_s14, %s519_s30  ;;  %s524_s24 = scalar_lea.hbm %s863_s1, 512 }
  0x34   : > { %p525_p0 = scmp.lt.u32.totalorder %s763_s14, %s863_s1  ;;  %p526_p2 = scmp.lt.u32.totalorder %s524_s24, %s519_s30 }
  0x35   : > { %p522_p8 = pnand %p520_p3, %p491_p1  ;;  %p528_p5 = scmp.lt.u32.totalorder %s519_s30, %s763_s14 }
  0x36   : > { %p527_p4 = por %p526_p2, %p525_p0 }
  0x37   : > { %p523_p10 = pneg %p522_p8 }
  0x38   : > { %p529_p7 = por %p528_p5, %p527_p4 }
  0x3a   : > { %p530_p9 = pnand %p529_p7, %p523_p10 }
  0x3c   : > { %533 = shalt.err (!%p530_p9)
}
  0x3d   : > { %s534_s25 = scalar_lea.vmem %s767_s17, 256  ;;  %s624_s7 = smov [#allocation5]  }
  0x3e   : > { %p535_p11 = scmp.ne.s32.totalorder %s767_s17, %s534_s25  ;;  %s539_s8 = sshll.u32 %s624_s7, 4  ;;  %s540_s8 = int_to_ptr.vmem [resolvable:$false] %s539_s8 }
  0x3f   : > { %s541_s16 = scalar_lea.vmem %s540_s8, 512  ;;  %p542_p6 = scmp.lt.s32.totalorder %s767_s17, %s540_s8 }
  0x40   : > { %p537_p3 = pnand %p535_p11, %p491_p1  ;;  %p543_p0 = scmp.lt.s32.totalorder %s541_s16, %s534_s25 }
  0x42   : > { %p538_p8 = pneg %p537_p3  ;;  %p544_p2 = por %p543_p0, %p542_p6 }
  0x44   : > { %p545_p4 = pnand %p544_p2, %p538_p8 }
  0x46   : > { %548 = shalt.err (!%p545_p4)
}
  0x47   : > { %448 = dma.hbm_to_vmem [thread:$0]  (!%p715_p13), %s763_s14, 256, %s767_s17, %s139_s28, %s622_s29, %s622_s29, %s623_s5  }
  0x48   : > { %161 = sbr.rel (%p754_p12) target bundleno = 316 (0x13c), region = 28  ;;  %s801_s30 = sand.u32 (!%p754_p12), 1, %s611_s10  }
  0x49   : > { %s408_s4 = sshll.u32 (!%p754_p12), %s801_s30, 4  ;;  %s164_s19 = scalar_lea.sflag (!%p754_p12), [#allocation3], %s801_s30 }
  0x4a   : > { %s167_s3 = scalar_lea.vmem (!%p754_p12), [#allocation2], %s408_s4  ;;  %p873_p6 = scmp.ne.s32.totalorder (!%p754_p12), %s868_s20, 0 }
  0x4f   : > { %594 = dma.done.wait (%p873_p6), %s164_s19, 256  }
  0x50   : > { %596 = vsyncadd (%p873_p6), %s164_s19, 4294967040  ;;  %s173_s23 = scalar_lea.sflag [#allocation6], %s801_s30  ;;  %s176_s29 = scalar_lea.vmem [#allocation5], %s408_s4 }
  0x51   : > { %598 = dma.done.wait (%p873_p6), %s173_s23, 256  }
  0x52   : > { %600 = vsyncadd (%p873_p6), %s173_s23, 4294967040  ;;  %vm206_vm0 = vcmask 130048   ;;  %v204_v0 = vld [vmem:[%s176_s29] sm:$0xff]  ;;  %v205_v1 = vld [vmem:[%s176_s29 + $0x8] sm:$0xff]  ;;  %s201_s5 = scalar_lea.vmem [#allocation7], %s408_s4  ;;  %s420_s14 = sshll.u32 %s662_s13, 8 }
  0x53   : > { %v202_v2 = vld [vmem:[%s167_s3] sm:$0xff]  ;;  %v432_v3 = vpack.c.bf16 %v205_v1, %v204_v0  ;;  %v203_v4 = vld [vmem:[%s167_s3 + $0x8] sm:$0xff]  ;;  %s305_s6 = sshll.u32 %s201_s5, 4  ;;  %s820_s28 = scalar_lea.hbm %s864_s2, %s420_s14  ;;  %s815_s6 = int_to_ptr.vmem [resolvable:$true] %s305_s6 }
  0x54   : > { %429 = vmatprep.mubr.msk.f32.mxu0 %vm206_vm0, %v202_v2  ;;  %s291_s24 = scalar_lea.sflag [#allocation4], %s801_s30  ;;  %s549_s26 = scalar_lea.vmem %s815_s6, 256 }
  0x55   : > { %433 = vmatprep.subr.bf16.mxu0 %v432_v3  ;;  %p550_p13 = scmp.ne.s32.totalorder %s815_s6, %s549_s26  ;;  %p874_p1 = scmp.ne.s32.totalorder %s869_s21, 0 }
  0x56   : > { %435 = vmatpush3.bf16.msra.mxu0 %v432_v3  ;;  %s625_s13 = smov [#allocation7]  }
  0x57   : > { %p551_p12 = pnand %p550_p13, %p874_p1  ;;  %s553_s27 = sshll.u32 %s625_s13, 4  ;;  %s554_s27 = int_to_ptr.vmem [resolvable:$false] %s553_s27 }
  0x58   : > { %s555_s25 = scalar_lea.vmem %s554_s27, 512  ;;  %p556_p5 = scmp.lt.s32.totalorder %s815_s6, %s554_s27 }
  0x59   : > { %430 = vmatmul.mubr.msk.f32.vlgmr.msra.gmra.mrb[0].mxu0 %vm206_vm0, %v203_v4  ;;  %p552_p10 = pneg %p551_p12  ;;  %p557_p7 = scmp.lt.s32.totalorder %s555_s25, %s549_s26 }
  0x5b   : > { %p558_p9 = por %p557_p7, %p556_p5 }
  0x5d   : > { %p559_p11 = pnand %p558_p9, %p552_p10 }
 0x12c   : > { %v431_v5 = vpop.f32.mrb[0].mxu0 }
 0x12d   : > { %289 = vst [vmem:[%s201_s5 + $0x8] sm:$0xff] %v431_v5  ;;  %v279_v6 = vpop.f32.mrb[1].mxu0 }
 0x12e   : > { %288 = vst [vmem:[%s201_s5] sm:$0xff] %v279_v6 }
 0x12f   : > { %562 = shalt.err (!%p559_p11)
}
 0x130   : > { %s563_s7 = scalar_lea.hbm %s820_s28, 256  ;;  %s567_s30 = scalar_lea.hbm %s864_s2, 512 }
 0x131   : > { %p564_p3 = scmp.ne.s32.totalorder %s820_s28, %s563_s7  ;;  %p568_p2 = scmp.lt.u32.totalorder %s820_s28, %s864_s2 }
 0x132   : > { %p569_p4 = scmp.lt.u32.totalorder %s567_s30, %s563_s7  ;;  %p571_p13 = scmp.lt.u32.totalorder %s563_s7, %s820_s28 }
 0x133   : > { %p565_p8 = pnand %p564_p3, %p874_p1 }
 0x134   : > { %p570_p6 = por %p569_p4, %p568_p2 }
 0x135   : > { %p566_p0 = pneg %p565_p8 }
 0x136   : > { %p572_p12 = por %p571_p13, %p570_p6 }
 0x138   : > { %p573_p10 = pnand %p572_p12, %p566_p0 }
 0x13a   : > { %576 = shalt.err (!%p573_p10)
}
 0x13b   : > { %440 = dma.vmem_to_hbm [thread:$0]  (%p874_p1), %s815_s6, 256, %s820_s28, %s291_s24  }
 0x13c PF: > { %s317_s3 = sand.u32 1, %s607_s9   ;;  %p875_p5 = scmp.ne.s32.totalorder %s870_s22, 0 }
 0x13d   : > { %p876_p7 = scmp.ge.s32.totalorder %s619_s12, 2  ;;  %s318_s23 = scalar_lea.sflag [#allocation4], %s317_s3 }
 0x13f   : > { %p450_p9 = pnand %p876_p7, %p875_p5 }
 0x141   : > { %602 = dma.done.wait (!%p450_p9), %s318_s23, 256  }
 0x142   : > { %604 = vsyncadd (!%p450_p9), %s318_s23, 4294967040  ;;  %p18_p11 = scmp.ge.s32.totalorder %s666_s15, 4   ;;  %s877_s9 = smov %s611_s10 }
 0x143   : > { %s878_s10 = smov %s615_s11  ;;  %s879_s11 = smov %s678_s18 }
 0x144   : > { %s880_s12 = smov %s666_s15  ;;  %20 = sbr.rel (!%p18_p11) target bundleno = 7 (0x7), region = 86 }
 0x14b   :  { %323 = vsyncpa [#allocation3], 1 }
 0x14c   :  { %325 = vsyncpa [#allocation3 + $0x1], 1 }
 0x14d   :  { %326 = vsyncpa [#allocation6], 1 }
 0x14e   :  { %328 = vsyncpa [#allocation6 + $0x1], 1 }
 0x14f   :  { %329 = vsyncpa [#allocation4], 1 }
 0x150   :  { %331 = vsyncpa [#allocation4 + $0x1], 1 }

</bundles_post_ra>
